<compile_context>
chip_gen: v6e
topology: v6e:2x2x1
jax: 0.10.0
libtpu: 0.0.40
codegen_flags: <defaults>
</compile_context>

<pallas_src>
import jax
import jax.numpy as jnp
from jax.experimental import pallas as pl
from jax.experimental.pallas import tpu as pltpu


# ----------------------------------------------------------------------------
# The actual Identity forward: zero work, zero HBM traffic.
# ----------------------------------------------------------------------------
def identity_forward(x: jax.Array) -> jax.Array:
    """Pallas-project implementation of Identity.forward: `return x`.

    The optimal TPU implementation of Identity is no kernel at all — any
    pallas_call would stream >= 2x the array size through HBM for nothing.
    """
    return x


# ----------------------------------------------------------------------------
# Optional materializing copy kernel (distinct output buffer), kept so the
# module still has a runnable Pallas kernel.
# ----------------------------------------------------------------------------
def _identity_copy_kernel(x_ref, o_ref):
    o_ref[...] = x_ref[...]


_TM = 512   # block rows  (multiple of 8, or full extent for small arrays)
_TN = 1024  # block cols  (multiple of 128, or full extent for small arrays)
_PAD_UNIT = 8 * 128  # flat padding unit so the 2D reshape is (8,128)-friendly


def _lane_dense_2d(total: int):
    """Pick (rows, cols) with cols a large multiple of 128; prefer rows >= 8
    for sublane density.  `total` must be a multiple of 128 here (callers pad
    first), so no degenerate (1, total) fallback exists anymore."""
    candidates = (1024, 2048, 4096, 8192, 512, 256, 128)
    for cols in candidates:
        if total % cols == 0 and total // cols >= 8:
            return total // cols, cols
    for cols in candidates:
        if total % cols == 0:
            return total // cols, cols
    raise ValueError(f"total={total} must be a multiple of 128 after padding")


def identity_forward_pallas(x: jax.Array) -> jax.Array:
    """Identity via an explicit Pallas copy kernel.

    Only useful when a *distinct* materialized buffer is required; otherwise
    prefer identity_forward (which is free).  Returns an array equal to x
    with the same shape and dtype.
    """
    if x.size == 0:
        return x

    orig_shape = x.shape
    total = x.size

    # Pad the flat array up to a multiple of 8*128 so the 2D view is always
    # lane-dense and block shapes satisfy the (8, 128) rule.
    flat = x.reshape(total)
    padded_total = pl.cdiv(total, _PAD_UNIT) * _PAD_UNIT
    if padded_total != total:
        flat = jnp.concatenate(
            [flat, jnp.zeros((padded_total - total,), dtype=x.dtype)]
        )

    rows, cols = _lane_dense_2d(padded_total)
    x2 = flat.reshape(rows, cols)

    # Tile sizes: large lane-dense tiles, falling back to full extent for
    # small arrays.  Cap tm so the row axis gives >= 2 blocks when it can,
    # letting v7x's second TensorCore participate (no-op on v5e/v6e).
    tm = _TM if rows >= _TM else rows
    tn = _TN if cols >= _TN else cols
    if rows >= 16 and rows // tm < 2:
        half = (rows // 2) // 8 * 8
        if half >= 8:
            tm = half

    grid = (pl.cdiv(rows, tm), pl.cdiv(cols, tn))

    out = pl.pallas_call(
        _identity_copy_kernel,
        out_shape=jax.ShapeDtypeStruct((rows, cols), x.dtype),
        grid=grid,
        in_specs=[pl.BlockSpec((tm, tn), lambda i, j: (i, j))],
        out_specs=pl.BlockSpec((tm, tn), lambda i, j: (i, j)),
        compiler_params=pltpu.CompilerParams(
            dimension_semantics=("parallel", "parallel"),
        ),
    )(x2)

    out_flat = out.reshape(padded_total)
    if padded_total != total:
        out_flat = out_flat[:total]
    return out_flat.reshape(orig_shape)


if __name__ == "__main__":
    key = jax.random.PRNGKey(0)
    # Small NCHW input consistent with a conv-style search-space primitive.
    x = jax.random.normal(key, (2, 4, 16, 16), dtype=jnp.float32)

    # The real Identity forward: zero-cost passthrough.
    y_fast = identity_forward(x)
    jax.block_until_ready(y_fast)
    assert y_fast.shape == x.shape and y_fast.dtype == x.dtype
    assert bool(jnp.all(y_fast == x))

    # Exercise the Pallas copy kernel once (materialized distinct buffer).
    y_kernel = identity_forward_pallas(x)
    jax.block_until_ready(y_kernel)
    assert y_kernel.shape == x.shape and y_kernel.dtype == x.dtype
    assert bool(jnp.all(y_kernel == x))

    print("KERNEL_OK")
</pallas_src>

<mosaic_0001>
module attributes {stable_mosaic.version = 11 : i64} {
  func.func @_identity_copy_kernel(%arg0: i32, %arg1: i32, %arg2: memref<8x256xf32, #tpu.memory_space<vmem>>, %arg3: memref<8x256xf32, #tpu.memory_space<vmem>>) attributes {dimension_semantics = [#tpu.dimension_semantics<parallel>, #tpu.dimension_semantics<parallel>], iteration_bounds = array<i64: 1, 1>, scalar_prefetch = 0 : i64, scratch_operands = 0 : i64, tpu.core_type = #tpu.core_type<tc>, window_params = [{transform_indices = @transform_0, window_bounds = array<i64: 8, 256>}, {transform_indices = @transform_1, window_bounds = array<i64: 8, 256>}]} {
    %c0 = arith.constant 0 : index
    %c0_0 = arith.constant 0 : index
    %0 = vector.load %arg2[%c0, %c0_0] : memref<8x256xf32, #tpu.memory_space<vmem>>, vector<8x256xf32>
    %c0_1 = arith.constant 0 : index
    %c0_2 = arith.constant 0 : index
    %1 = vector.load %arg3[%c0_1, %c0_2] : memref<8x256xf32, #tpu.memory_space<vmem>>, vector<8x256xf32>
    tpu.vector_store %arg3[%c0_1, %c0_2], %0 {strides = array<i32>} : memref<8x256xf32, #tpu.memory_space<vmem>>, vector<8x256xf32>,
    return
  }
  func.func @transform_0(%arg0: i32, %arg1: i32) -> (i32, i32) {
    %c0_i32 = arith.constant 0 : i32
    return %arg0, %arg1 : i32, i32
  }
  func.func @transform_1(%arg0: i32, %arg1: i32) -> (i32, i32) {
    %c0_i32 = arith.constant 0 : i32
    return %arg0, %arg1 : i32, i32
  }
}

</mosaic_0001>

<bundles_post_ra>
// kernel: tpu_custom_call.1
= control target key start
LH: loop header
LB: loop body
LE: loop exit
PB: predicated region body
PF: predicated region fallthrough
CT: control target
= control target key end

     0   :  { %6 = vsyncpa [#allocation3], 0  ;;  %s104_s0 = inlined_call_operand.hbm [shape: f32[8,256], index: 0, kind: input, shape index: {}]   ;;  %s105_s1 = inlined_call_operand.hbm [shape: f32[8,256], index: 1, kind: output, shape index: {}]  }
   0x1   :  { %7 = vsyncpa [#allocation4], 0  ;;  %s86_s6 = smov [#allocation2]  }
   0x2   :  { %s14_s7 = sshll.u32 %s86_s6, 4  ;;  %s15_s7 = int_to_ptr.vmem [resolvable:$true] %s14_s7 }
   0x3   :  { %s50_s8 = scalar_lea.vmem %s15_s7, 256  ;;  %p55_p1 = scmp.lt.s32.totalorder %s15_s7, %s15_s7 }
   0x4   :  { %p51_p0 = scmp.ne.s32.totalorder %s15_s7, %s50_s8  ;;  %p56_p2 = scmp.lt.s32.totalorder %s50_s8, %s50_s8 }
   0x6   :  { %p57_p3 = por %p56_p2, %p55_p1 }
   0x8   :  { %p58_p4 = pnand %p57_p3, %p51_p0 }
   0xa   :  { %61 = shalt.err (!%p58_p4)
}
   0xb   :  { %17 = dma.hbm_to_vmem [thread:$0]  %s104_s0, 256, %s15_s7, [#allocation3]  }
   0xc   :  { %82 = dma.done.wait [#allocation3], 256  }
   0xd   :  { %83 = vsyncadd [#allocation3], 4294967040  ;;  %s87_s11 = smov [#allocation5]   ;;  %v21_v0 = vld [vmem:[#allocation2] sm:$0xff]  ;;  %v22_v1 = vld [vmem:[#allocation2 + $0x8] sm:$0xff] }
   0xe   :  { %s31_s12 = sshll.u32 %s87_s11, 4  ;;  %23 = vst [vmem:[#allocation5] sm:$0xff] %v21_v0  ;;  %24 = vst [vmem:[#allocation5 + $0x8] sm:$0xff] %v22_v1  ;;  %s32_s12 = int_to_ptr.vmem [resolvable:$true] %s31_s12 }
   0xf   :  { %s62_s13 = scalar_lea.vmem %s32_s12, 256  ;;  %p67_p6 = scmp.lt.s32.totalorder %s32_s12, %s32_s12 }
  0x10   :  { %p63_p5 = scmp.ne.s32.totalorder %s32_s12, %s62_s13  ;;  %p68_p7 = scmp.lt.s32.totalorder %s62_s13, %s62_s13 }
  0x12   :  { %p69_p8 = por %p68_p7, %p67_p6 }
  0x14   :  { %p70_p9 = pnand %p69_p8, %p63_p5 }
  0x16   :  { %73 = shalt.err (!%p70_p9)
}
  0x17   :  { %34 = dma.vmem_to_hbm [thread:$0]  %s32_s12, 256, %s105_s1, [#allocation4]  }
  0x18   :  { %84 = dma.done.wait [#allocation4], 256  }
  0x19   :  { %85 = vsyncadd [#allocation4], 4294967040 }
  0x1a   :  { %38 = vsyncpa [#allocation3], 1 }
  0x1b   :  { %39 = vsyncpa [#allocation4], 1 }

</bundles_post_ra>
